<compile_context>
chip_gen: v7x
topology: tpu7x:2x2x1
jax: 0.10.0
libtpu: 0.0.40
codegen_flags: <defaults>
</compile_context>

<pallas_src>
import functools

import numpy as np
import jax
import jax.numpy as jnp
from jax.experimental import pallas as pl
from jax.experimental.pallas import tpu as pltpu


@functools.lru_cache(maxsize=None)
def _unconv_plan(H, W, k, s):
    """Trace-time (NumPy) construction of the tiny placement weights."""
    W_out = 2 * W
    c0 = k // 2 - k                    # NOTE: faithful to reference, p := k
    A = W_out * c0 + c0                # flat destination of input (0, 0)
    Ar, Ac = divmod(A, W_out)          # floor divmod: A = W_out*Ar + Ac
    cj = np.arange(W)
    carry = (Ac + s * cj) // W_out
    dcol = (Ac + s * cj) % W_out
    ci = np.arange(H)
    rts, cs = [], []
    for g in np.unique(carry):
        rt = np.zeros((H, 2 * H), np.float32)          # R_g^T  (H, 2H)
        rt[ci, (s * ci + Ar + int(g)) % (2 * H)] = 1.0
        cmat = np.zeros((W, W_out), np.float32)        # C_g    (W, 2W)
        sel = carry == g
        cmat[cj[sel], dcol[sel]] = 1.0
        rts.append(rt)
        cs.append(cmat)
    return np.stack(rts), np.stack(cs)  # (G, H, 2H), (G, W, 2W)


def _unconv_kernel(x_ref, rt_ref, c_ref, o_ref):
    # x_ref : (tm, H, W)   rt_ref: (G, H, 2H)   c_ref: (G, W, 2W)
    # o_ref : (tm, 2H, 2W)
    tm, H, W = x_ref.shape
    G = rt_ref.shape[0]
    H2 = o_ref.shape[1]
    W2 = o_ref.shape[2]

    x = x_ref[...].astype(jnp.float32)                     # (tm, H, W)
    # Put the contracted row dim (H) in the lane position once, shared by all
    # groups: (tm, H, W) -> (tm, W, H) -> (tm*W, H)
    xt = jnp.swapaxes(x, 1, 2).reshape(tm * W, H)

    acc = None
    for g in range(G):                                     # G <= 2, static loop
        # Row placement on the MXU: (tm*W, H) @ (H, 2H) -> (tm*W, 2H)
        v = jnp.dot(xt, rt_ref[g], preferred_element_type=jnp.float32)
        # (tm, W, 2H) -> (tm, 2H, W) -> (tm*2H, W)
        v = jnp.swapaxes(v.reshape(tm, W, H2), 1, 2).reshape(tm * H2, W)
        # Column placement on the MXU: (tm*2H, W) @ (W, 2W) -> (tm*2H, 2W)
        part = jnp.dot(v, c_ref[g], preferred_element_type=jnp.float32)
        acc = part if acc is None else acc + part

    o_ref[...] = acc.reshape(tm, H2, W2).astype(o_ref.dtype)


def _pick_tm(M, H, W):
    """Images per grid step: VMEM-bounded, capped so large M keeps >=2 steps
    (megacore / dual-TC) and safe on v7x's smaller VMEM."""
    per_image = 4 * H * W * 24            # in + out (double-buffered) + temps, bytes
    budget = 12 * 1024 * 1024             # well under the 32 MiB scoped default
    tm = max(1, min(M, budget // per_image))
    tm = min(tm, 1024)
    if M >= 16:
        tm = min(tm, -(-M // 2))          # at least 2 parallel grid steps
    return tm


def un_conv(x, kernel_size, stride, padding):
    """Exact re-implementation of UnConv.forward (padding is unused, as in the
    reference)."""
    del padding  # faithful to the PyTorch module: p is overwritten with k
    B, C, H, W = x.shape
    rt_np, c_np = _unconv_plan(int(H), int(W), int(kernel_size), int(stride))
    G = rt_np.shape[0]
    M = B * C

    x_flat = x.reshape(M, H, W).astype(jnp.float32)
    rt = jnp.asarray(rt_np)
    cg = jnp.asarray(c_np)

    tm = _pick_tm(M, H, W)
    n_m = pl.cdiv(M, tm)

    out = pl.pallas_call(
        _unconv_kernel,
        out_shape=jax.ShapeDtypeStruct((M, 2 * H, 2 * W), jnp.float32),
        grid=(n_m,),
        in_specs=[
            pl.BlockSpec((tm, H, W), lambda i: (i, 0, 0)),
            pl.BlockSpec((G, H, 2 * H), lambda i: (0, 0, 0)),
            pl.BlockSpec((G, W, 2 * W), lambda i: (0, 0, 0)),
        ],
        out_specs=pl.BlockSpec((tm, 2 * H, 2 * W), lambda i: (i, 0, 0)),
        compiler_params=pltpu.CompilerParams(dimension_semantics=("parallel",)),
    )(x_flat, rt, cg)

    return out.reshape(B, C, 2 * H, 2 * W)


if __name__ == "__main__":
    B, C, H, W = 2, 4, 16, 16
    kernel_size, stride, padding = 2, 2, 0

    key = jax.random.PRNGKey(0)
    x = jax.random.normal(key, (B, C, H, W), dtype=jnp.float32)

    y = un_conv(x, kernel_size, stride, padding)
    y = jax.block_until_ready(y)
    assert y.shape == (B, C, 2 * H, 2 * W)

    # Pure-JAX reference: the original one-hot scatter matmul semantics
    # (including the negative-index wrap via mod 4HW).
    k, s, p = kernel_size, stride, kernel_size
    W_out = 2 * W
    ii, jj = jnp.meshgrid(jnp.arange(H), jnp.arange(W), indexing="ij")
    idx = W_out * (k // 2 - p + s * ii) + (k // 2 - p + s * jj)
    rows = jnp.mod(idx.reshape(-1), 4 * H * W)
    inv_t = jax.nn.one_hot(rows, 4 * H * W, dtype=jnp.float32)
    y_ref = (x.reshape(B * C, H * W) @ inv_t).reshape(B, C, 2 * H, 2 * W)
    assert jnp.allclose(y, y_ref, atol=1e-5, rtol=1e-5)

    print("KERNEL_OK")
</pallas_src>

<mosaic_0001>
module attributes {stable_mosaic.version = 11 : i64} {
  func.func @_unconv_kernel(%arg0: i32, %arg1: memref<8x16x16xf32, #tpu.memory_space<vmem>>, %arg2: memref<2x16x32xf32, #tpu.memory_space<vmem>>, %arg3: memref<2x16x32xf32, #tpu.memory_space<vmem>>, %arg4: memref<8x32x32xf32, #tpu.memory_space<vmem>>) attributes {dimension_semantics = [#tpu.dimension_semantics<parallel>], iteration_bounds = array<i64: 1>, scalar_prefetch = 0 : i64, scratch_operands = 0 : i64, tpu.core_type = #tpu.core_type<tc>, window_params = [{transform_indices = @transform_0, window_bounds = array<i64: 8, 16, 16>}, {pipeline_mode = #tpu.pipeline_mode<synchronous>, transform_indices = @transform_1, window_bounds = array<i64: 2, 16, 32>}, {pipeline_mode = #tpu.pipeline_mode<synchronous>, transform_indices = @transform_2, window_bounds = array<i64: 2, 16, 32>}, {transform_indices = @transform_3, window_bounds = array<i64: 8, 32, 32>}]} {
    %c0 = arith.constant 0 : index
    %c0_0 = arith.constant 0 : index
    %c0_1 = arith.constant 0 : index
    %0 = vector.load %arg1[%c0, %c0_0, %c0_1] : memref<8x16x16xf32, #tpu.memory_space<vmem>>, vector<8x16x16xf32>
    %1 = tpu.transpose %0, [0, 2, 1] : vector<8x16x16xf32> -> vector<8x16x16xf32>
    %2 = vector.shape_cast %1 : vector<8x16x16xf32> to vector<128x16xf32>
    %c0_2 = arith.constant 0 : index
    %c0_3 = arith.constant 0 : index
    %c0_4 = arith.constant 0 : index
    %3 = vector.load %arg2[%c0_2, %c0_3, %c0_4] : memref<2x16x32xf32, #tpu.memory_space<vmem>>, vector<1x16x32xf32>
    %4 = vector.shape_cast %3 : vector<1x16x32xf32> to vector<16x32xf32>
    %cst = arith.constant dense<0.000000e+00> : vector<128x32xf32>
    %5 = tpu.matmul %2, %4, %cst {dimension_numbers = #tpu.dot_dimension_numbers<[1], [0], [0], [1], [0, 0, 1, 1], [], []>} : vector<128x16xf32>, vector<16x32xf32>, vector<128x32xf32> -> vector<128x32xf32>
    %6 = vector.shape_cast %5 : vector<128x32xf32> to vector<8x16x32xf32>
    %7 = tpu.transpose %6, [0, 2, 1] : vector<8x16x32xf32> -> vector<8x32x16xf32>
    %8 = vector.shape_cast %7 : vector<8x32x16xf32> to vector<256x16xf32>
    %c0_5 = arith.constant 0 : index
    %c0_6 = arith.constant 0 : index
    %c0_7 = arith.constant 0 : index
    %9 = vector.load %arg3[%c0_5, %c0_6, %c0_7] : memref<2x16x32xf32, #tpu.memory_space<vmem>>, vector<1x16x32xf32>
    %10 = vector.shape_cast %9 : vector<1x16x32xf32> to vector<16x32xf32>
    %cst_8 = arith.constant dense<0.000000e+00> : vector<256x32xf32>
    %11 = tpu.matmul %8, %10, %cst_8 {dimension_numbers = #tpu.dot_dimension_numbers<[1], [0], [0], [1], [0, 0, 1, 1], [], []>} : vector<256x16xf32>, vector<16x32xf32>, vector<256x32xf32> -> vector<256x32xf32>
    %c1 = arith.constant 1 : index
    %c0_9 = arith.constant 0 : index
    %c0_10 = arith.constant 0 : index
    %12 = vector.load %arg2[%c1, %c0_9, %c0_10] : memref<2x16x32xf32, #tpu.memory_space<vmem>>, vector<1x16x32xf32>
    %13 = vector.shape_cast %12 : vector<1x16x32xf32> to vector<16x32xf32>
    %cst_11 = arith.constant dense<0.000000e+00> : vector<128x32xf32>
    %14 = tpu.matmul %2, %13, %cst_11 {dimension_numbers = #tpu.dot_dimension_numbers<[1], [0], [0], [1], [0, 0, 1, 1], [], []>} : vector<128x16xf32>, vector<16x32xf32>, vector<128x32xf32> -> vector<128x32xf32>
    %15 = vector.shape_cast %14 : vector<128x32xf32> to vector<8x16x32xf32>
    %16 = tpu.transpose %15, [0, 2, 1] : vector<8x16x32xf32> -> vector<8x32x16xf32>
    %17 = vector.shape_cast %16 : vector<8x32x16xf32> to vector<256x16xf32>
    %c1_12 = arith.constant 1 : index
    %c0_13 = arith.constant 0 : index
    %c0_14 = arith.constant 0 : index
    %18 = vector.load %arg3[%c1_12, %c0_13, %c0_14] : memref<2x16x32xf32, #tpu.memory_space<vmem>>, vector<1x16x32xf32>
    %19 = vector.shape_cast %18 : vector<1x16x32xf32> to vector<16x32xf32>
    %cst_15 = arith.constant dense<0.000000e+00> : vector<256x32xf32>
    %20 = tpu.matmul %17, %19, %cst_15 {dimension_numbers = #tpu.dot_dimension_numbers<[1], [0], [0], [1], [0, 0, 1, 1], [], []>} : vector<256x16xf32>, vector<16x32xf32>, vector<256x32xf32> -> vector<256x32xf32>
    %21 = arith.addf %11, %20 : vector<256x32xf32>
    %22 = vector.shape_cast %21 : vector<256x32xf32> to vector<8x32x32xf32>
    %c0_16 = arith.constant 0 : index
    %c0_17 = arith.constant 0 : index
    %c0_18 = arith.constant 0 : index
    %23 = vector.load %arg4[%c0_16, %c0_17, %c0_18] : memref<8x32x32xf32, #tpu.memory_space<vmem>>, vector<8x32x32xf32>
    tpu.vector_store %arg4[%c0_16, %c0_17, %c0_18], %22 {strides = array<i32>} : memref<8x32x32xf32, #tpu.memory_space<vmem>>, vector<8x32x32xf32>,
    return
  }
  func.func @transform_0(%arg0: i32) -> (i32, i32, i32) {
    %c0_i32 = arith.constant 0 : i32
    %c0_i32_0 = arith.constant 0 : i32
    %c0_i32_1 = arith.constant 0 : i32
    return %arg0, %c0_i32, %c0_i32_0 : i32, i32, i32
  }
  func.func @transform_1(%arg0: i32) -> (i32, i32, i32) {
    %c0_i32 = arith.constant 0 : i32
    %c0_i32_0 = arith.constant 0 : i32
    %c0_i32_1 = arith.constant 0 : i32
    %c0_i32_2 = arith.constant 0 : i32
    return %c0_i32, %c0_i32_0, %c0_i32_1 : i32, i32, i32
  }
  func.func @transform_2(%arg0: i32) -> (i32, i32, i32) {
    %c0_i32 = arith.constant 0 : i32
    %c0_i32_0 = arith.constant 0 : i32
    %c0_i32_1 = arith.constant 0 : i32
    %c0_i32_2 = arith.constant 0 : i32
    return %c0_i32, %c0_i32_0, %c0_i32_1 : i32, i32, i32
  }
  func.func @transform_3(%arg0: i32) -> (i32, i32, i32) {
    %c0_i32 = arith.constant 0 : i32
    %c0_i32_0 = arith.constant 0 : i32
    %c0_i32_1 = arith.constant 0 : i32
    return %arg0, %c0_i32, %c0_i32_0 : i32, i32, i32
  }
}

</mosaic_0001>

<bundles_post_ra>
// kernel: tpu_custom_call.1
= control target key start
LH: loop header
LB: loop body
LE: loop exit
PB: predicated region body
PF: predicated region fallthrough
CT: control target
= control target key end

     0   :  { %8 = vsyncpa [#allocation3], 0  ;;  %s2612_s0 = inlined_call_operand.hbm [shape: f32[8,16,16], index: 0, kind: input, shape index: {}]   ;;  %s2613_s1 = inlined_call_operand.hbm [shape: f32[2,16,32], index: 1, kind: input, shape index: {}]   ;;  %s2614_s2 = inlined_call_operand.hbm [shape: f32[2,16,32], index: 2, kind: input, shape index: {}]   ;;  %s2615_s3 = inlined_call_operand.hbm [shape: f32[8,32,32], index: 3, kind: output, shape index: {}]  }
   0x1   :  { %9 = vsyncpa [#allocation6], 0 }
   0x2   :  { %10 = vsyncpa [#allocation4], 0  ;;  %s2391_s12 = smov [#allocation5]   ;;  %s2392_s14 = smov [#allocation2]  }
   0x3   :  { %s28_s13 = sshll.u32 %s2391_s12, 4  ;;  %s16_s15 = sshll.u32 %s2392_s14, 4  ;;  %s29_s13 = int_to_ptr.vmem [resolvable:$true] %s28_s13  ;;  %s2417_s15 = int_to_ptr.vmem [resolvable:$true] %s16_s15 }
   0x4   :  { %s2297_s18 = scalar_lea.hbm %s2613_s1, 512 }
   0x5   :  { %p2298_p0 = scmp.ne.s32.totalorder %s2613_s1, %s2297_s18  ;;  %p2301_p1 = scmp.lt.u32.totalorder %s2297_s18, %s2613_s1 }
   0x7   :  { %p2303_p2 = pnand %p2301_p1, %p2298_p0 }
   0x9   :  { %2306 = shalt.err (!%p2303_p2)
}
   0xa   :  { %s2307_s23 = scalar_lea.vmem %s29_s13, 512  ;;  %p2312_p4 = scmp.lt.s32.totalorder %s29_s13, %s29_s13 }
   0xb   :  { %p2308_p3 = scmp.ne.s32.totalorder %s29_s13, %s2307_s23  ;;  %p2313_p5 = scmp.lt.s32.totalorder %s2307_s23, %s2307_s23 }
   0xd   :  { %p2314_p6 = por %p2313_p5, %p2312_p4 }
   0xf   :  { %p2315_p7 = pnand %p2314_p6, %p2308_p3 }
  0x11   :  { %2318 = shalt.err (!%p2315_p7)
}
  0x12   :  { %s2393_s24 = smov 128   ;;  %s2394_s25 = smov 8  }
  0x13   :  { %34 = dma.hbm_to_vmem [thread:$0]  %s2613_s1, 512, %s29_s13, [#allocation6], %s2393_s24, %s2393_s24, %s2394_s25  }
  0x14   :  { %s2319_s30 = scalar_lea.hbm %s2612_s0, 2048 }
  0x15   :  { %p2320_p8 = scmp.ne.s32.totalorder %s2612_s0, %s2319_s30  ;;  %p2323_p9 = scmp.lt.u32.totalorder %s2319_s30, %s2612_s0 }
  0x17   :  { %p2325_p10 = pnand %p2323_p9, %p2320_p8 }
  0x19   :  { %2328 = shalt.err (!%p2325_p10)
}
  0x1a   :  { %s2329_s8 = scalar_lea.vmem %s2417_s15, 2048  ;;  %p2334_p12 = scmp.lt.s32.totalorder %s2417_s15, %s2417_s15 }
  0x1b   :  { %p2330_p11 = scmp.ne.s32.totalorder %s2417_s15, %s2329_s8  ;;  %p2335_p13 = scmp.lt.s32.totalorder %s2329_s8, %s2329_s8 }
  0x1d   :  { %p2336_p0 = por %p2335_p13, %p2334_p12 }
  0x1f   :  { %p2337_p1 = pnand %p2336_p0, %p2330_p11 }
  0x21   :  { %2340 = shalt.err (!%p2337_p1)
}
  0x22   :  { %22 = dma.hbm_to_vmem [thread:$0]  %s2612_s0, 2048, %s2417_s15, [#allocation3], %s2393_s24, %s2393_s24, %s2394_s25  }
  0x23   :  { %s2395_s10 = smov [#allocation7]   ;;  %s2341_s14 = scalar_lea.hbm %s2614_s2, 512 }
  0x24   :  { %s40_s11 = sshll.u32 %s2395_s10, 4  ;;  %p2342_p2 = scmp.ne.s32.totalorder %s2614_s2, %s2341_s14  ;;  %s41_s11 = int_to_ptr.vmem [resolvable:$true] %s40_s11 }
  0x25   :  { %p2345_p3 = scmp.lt.u32.totalorder %s2341_s14, %s2614_s2 }
  0x27   :  { %p2347_p4 = pnand %p2345_p3, %p2342_p2 }
  0x29   :  { %2350 = shalt.err (!%p2347_p4)
}
  0x2a   :  { %s2351_s20 = scalar_lea.vmem %s41_s11, 512  ;;  %p2356_p6 = scmp.lt.s32.totalorder %s41_s11, %s41_s11 }
  0x2b   :  { %p2352_p5 = scmp.ne.s32.totalorder %s41_s11, %s2351_s20  ;;  %p2357_p7 = scmp.lt.s32.totalorder %s2351_s20, %s2351_s20 }
  0x2d   :  { %p2358_p8 = por %p2357_p7, %p2356_p6 }
  0x2f   :  { %p2359_p9 = pnand %p2358_p8, %p2352_p5 }
  0x31   :  { %2362 = shalt.err (!%p2359_p9)
}
  0x32   :  { %46 = dma.hbm_to_vmem [thread:$0]  %s2614_s2, 512, %s41_s11, [#allocation6], %s2393_s24, %s2393_s24, %s2394_s25  }
  0x33   :  { %2385 = dma.done.wait [#allocation3], 2048  }
  0x34   :  { %2386 = vsyncadd [#allocation3], 4294965248 }
  0x35   :  { %2387 = dma.done.wait [#allocation6], 1024  }
  0x36   :  { %2388 = vsyncadd [#allocation6], 4294966272  ;;  %v56_v0 = vld [vmem:[#allocation2] sm:$0xff]  ;;  %v58_v1 = vld [vmem:[#allocation2 + $0x10] sm:$0xff]  ;;  %vm330_vm0 = vcmask 130048   ;;  %vm1831_vm1 = vcmask 261120  }
  0x37   :  { %72 = vxpose.xlu0.b32.start [1/2] (short) (narrow) %v56_v0, 16  ;;  %104 = vxpose.xlu1.b32.start [1/2] (short) (narrow) %v58_v1, 16  ;;  %v57_v2 = vld [vmem:[#allocation2 + $0x8] sm:$0xff]  ;;  %v59_v3 = vld [vmem:[#allocation2 + $0x18] sm:$0xff]  ;;  %v60_v4 = vld [vmem:[#allocation2 + $0x20] sm:$0xff]  ;;  %s2396_s2 = smov [#allocation8]  }
  0x38   :  { %v328_v5 = vld [vmem:[#allocation5] sm:$0xff]  ;;  %v329_v6 = vld [vmem:[#allocation5 + $0x8] sm:$0xff]  ;;  %v62_v7 = vld [vmem:[#allocation2 + $0x30] sm:$0xff]  ;;  %s1869_s21 = sshll.u32 %s2396_s2, 4  ;;  %s1870_s21 = int_to_ptr.vmem [resolvable:$true] %s1869_s21 }
  0x39   :  { %v2242_v8 = vpack.c.bf16 %v329_v6, %v328_v5  ;;  %v783_v9 = vld [vmem:[#allocation5 + $0x10] sm:$0xff]  ;;  %v784_v10 = vld [vmem:[#allocation5 + $0x18] sm:$0xff]  ;;  %v61_v12 = vld [vmem:[#allocation2 + $0x28] sm:$0xff]  ;;  %s2363_s22 = scalar_lea.vmem %s1870_s21, 4096  ;;  %p2368_p11 = scmp.lt.s32.totalorder %s1870_s21, %s1870_s21 }
  0x3a   :  { %v2246_v11 = vpack.c.bf16 %v784_v10, %v783_v9  ;;  %v63_v13 = vld [vmem:[#allocation2 + $0x38] sm:$0xff]  ;;  %v64_v14 = vld [vmem:[#allocation2 + $0x40] sm:$0xff]  ;;  %v66_v15 = vld [vmem:[#allocation2 + $0x50] sm:$0xff]  ;;  %p2364_p10 = scmp.ne.s32.totalorder %s1870_s21, %s2363_s22  ;;  %p2369_p12 = scmp.lt.s32.totalorder %s2363_s22, %s2363_s22 }
  0x3b   :  { %73 = vxpose.xlu0.b32.end [2/2] (short) (narrow) %v57_v2, 16  ;;  %105 = vxpose.xlu1.b32.end [2/2] (short) (narrow) %v59_v3, 16  ;;  %v65_v16 = vld [vmem:[#allocation2 + $0x48] sm:$0xff]  ;;  %v67_v17 = vld [vmem:[#allocation2 + $0x58] sm:$0xff]  ;;  %v68_v18 = vld [vmem:[#allocation2 + $0x60] sm:$0xff] }
  0x3c   :  { %2243 = vmatprep.subr.bf16.mxu0 %v2242_v8  ;;  %2247 = vmatprep.subr.bf16.mxu1 %v2246_v11  ;;  %v70_v19 = vld [vmem:[#allocation2 + $0x70] sm:$0xff]  ;;  %v69_v20 = vld [vmem:[#allocation2 + $0x68] sm:$0xff]  ;;  %v71_v21 = vld [vmem:[#allocation2 + $0x78] sm:$0xff]  ;;  %p2370_p13 = por %p2369_p12, %p2368_p11 }
  0x3d   :  { %2245 = vmatpush3.bf16.msra.mxu0 %v2242_v8  ;;  %2249 = vmatpush3.bf16.msra.mxu1 %v2246_v11  ;;  %v1187_v40 = vld [vmem:[#allocation7 + $0x10] sm:$0xff]  ;;  %v1188_v41 = vld [vmem:[#allocation7 + $0x18] sm:$0xff]  ;;  %v780_v42 = vld [vmem:[#allocation7] sm:$0xff] }
  0x3e   :  { %v2250_v45 = vpack.c.bf16 %v1188_v41, %v1187_v40  ;;  %v781_v46 = vld [vmem:[#allocation7 + $0x8] sm:$0xff]  ;;  %p2371_p0 = pnand %p2370_p13, %p2364_p10 }
  0x3f   :  { %136 = vxpose.xlu0.b32.start [1/2] (short) (narrow) %v60_v4, 16  ;;  %168 = vxpose.xlu1.b32.start [1/2] (short) (narrow) %v62_v7, 16  ;;  %v2254_v47 = vpack.c.bf16 %v781_v46, %v780_v42 }
  0x40   :  { %2251 = vmatprep.subr.bf16.mxu1 %v2250_v45 }
  0x41   :  { %2255 = vmatprep.subr.bf16.mxu0 %v2254_v47 }
  0x43   :  { %137 = vxpose.xlu0.b32.end [2/2] (short) (narrow) %v61_v12, 16  ;;  %169 = vxpose.xlu1.b32.end [2/2] (short) (narrow) %v63_v13, 16 }
  0x47   :  { %200 = vxpose.xlu0.b32.start [1/2] (short) (narrow) %v64_v14, 16  ;;  %232 = vxpose.xlu1.b32.start [1/2] (short) (narrow) %v66_v15, 16 }
  0x4b   :  { %201 = vxpose.xlu0.b32.end [2/2] (short) (narrow) %v65_v16, 16  ;;  %233 = vxpose.xlu1.b32.end [2/2] (short) (narrow) %v67_v17, 16 }
  0x4f   :  { %264 = vxpose.xlu0.b32.start [1/2] (short) (narrow) %v68_v18, 16  ;;  %296 = vxpose.xlu1.b32.start [1/2] (short) (narrow) %v70_v19, 16 }
  0x53   :  { %265 = vxpose.xlu0.b32.end [2/2] (short) (narrow) %v69_v20, 16  ;;  %297 = vxpose.xlu1.b32.end [2/2] (short) (narrow) %v71_v21, 16 }
  0xb7   :  { %v88_v22 = vpop.trf.xlu0  ;;  %v120_v23 = vpop.trf.xlu1 }
  0xb8   :  { %2086 = vmatprep.mubr.msk.f32.mxu0 %vm330_vm0, %v88_v22  ;;  %2114 = vmatprep.mubr.msk.f32.mxu1 %vm330_vm0, %v88_v22 }
  0xbb   :  { %v89_v24 = vpop.trf.xlu0  ;;  %v121_v25 = vpop.trf.xlu1 }
  0xbc   :  { %2087 = vmatmul.mubr.msk.f32.vlgmr.msra.gmra.mrb[0].mxu0 %vm330_vm0, %v89_v24  ;;  %2115 = vmatmul.mubr.msk.f32.vlgmr.msra.gmra.mrb[0].mxu1 %vm330_vm0, %v89_v24 }
  0xbd   :  { %2089 = vmatprep.mubr.msk.f32.mxu0 %vm330_vm0, %v120_v23  ;;  %2117 = vmatprep.mubr.msk.f32.mxu1 %vm330_vm0, %v120_v23 }
  0xbe   :  { %2253 = vmatpush3.bf16.msra.mxu1 %v2250_v45  ;;  %2257 = vmatpush3.bf16.msra.mxu0 %v2254_v47 }
  0xbf   :  { %v152_v26 = vpop.trf.xlu0  ;;  %v184_v27 = vpop.trf.xlu1 }
  0xc0   :  { %2090 = vmatmul.mubr.msk.f32.gmra.mrb[2].mxu0 %vm330_vm0, %v121_v25  ;;  %2118 = vmatmul.mubr.msk.f32.gmra.mrb[2].mxu1 %vm330_vm0, %v121_v25 }
  0xc1   :  { %2092 = vmatprep.mubr.msk.f32.mxu0 %vm330_vm0, %v152_v26  ;;  %2120 = vmatprep.mubr.msk.f32.mxu1 %vm330_vm0, %v152_v26 }
  0xc3   :  { %v153_v28 = vpop.trf.xlu0  ;;  %v185_v29 = vpop.trf.xlu1 }
  0xc4   :  { %2093 = vmatmul.mubr.msk.f32.gmra.mrb[4].mxu0 %vm330_vm0, %v153_v28  ;;  %2121 = vmatmul.mubr.msk.f32.gmra.mrb[4].mxu1 %vm330_vm0, %v153_v28 }
  0xc5   :  { %2095 = vmatprep.mubr.msk.f32.mxu0 %vm330_vm0, %v184_v27  ;;  %2123 = vmatprep.mubr.msk.f32.mxu1 %vm330_vm0, %v184_v27 }
  0xc7   :  { %v216_v30 = vpop.trf.xlu0  ;;  %v248_v31 = vpop.trf.xlu1 }
  0xc8   :  { %2096 = vmatmul.mubr.msk.f32.gmra.mrb[6].mxu0 %vm330_vm0, %v185_v29  ;;  %2124 = vmatmul.mubr.msk.f32.gmra.mrb[6].mxu1 %vm330_vm0, %v185_v29 }
  0xc9   :  { %2098 = vmatprep.mubr.msk.f32.mxu0 %vm330_vm0, %v216_v30  ;;  %2126 = vmatprep.mubr.msk.f32.mxu1 %vm330_vm0, %v216_v30 }
  0xcb   :  { %v217_v32 = vpop.trf.xlu0  ;;  %v249_v33 = vpop.trf.xlu1 }
  0xcc   :  { %2099 = vmatmul.mubr.msk.f32.gmra.mrb[8].mxu0 %vm330_vm0, %v217_v32  ;;  %2127 = vmatmul.mubr.msk.f32.gmra.mrb[8].mxu1 %vm330_vm0, %v217_v32 }
  0xcd   :  { %2101 = vmatprep.mubr.msk.f32.mxu0 %vm330_vm0, %v248_v31  ;;  %2129 = vmatprep.mubr.msk.f32.mxu1 %vm330_vm0, %v248_v31 }
  0xcf   :  { %v280_v34 = vpop.trf.xlu0  ;;  %v312_v35 = vpop.trf.xlu1 }
  0xd0   :  { %2102 = vmatmul.mubr.msk.f32.gmra.mrb[10].mxu0 %vm330_vm0, %v249_v33  ;;  %2130 = vmatmul.mubr.msk.f32.gmra.mrb[10].mxu1 %vm330_vm0, %v249_v33 }
  0xd1   :  { %2104 = vmatprep.mubr.msk.f32.mxu0 %vm330_vm0, %v280_v34  ;;  %2132 = vmatprep.mubr.msk.f32.mxu1 %vm330_vm0, %v280_v34 }
  0xd3   :  { %v281_v36 = vpop.trf.xlu0  ;;  %v313_v37 = vpop.trf.xlu1 }
  0xd4   :  { %2105 = vmatmul.mubr.msk.f32.gmra.mrb[12].mxu0 %vm330_vm0, %v281_v36  ;;  %2133 = vmatmul.mubr.msk.f32.gmra.mrb[12].mxu1 %vm330_vm0, %v281_v36 }
  0xd5   :  { %2107 = vmatprep.mubr.msk.f32.mxu0 %vm330_vm0, %v312_v35  ;;  %2135 = vmatprep.mubr.msk.f32.mxu1 %vm330_vm0, %v312_v35 }
  0xd8   :  { %2108 = vmatmul.mubr.msk.f32.gmra.mrb[14].mxu0 %vm330_vm0, %v313_v37  ;;  %2136 = vmatmul.mubr.msk.f32.gmra.mrb[14].mxu1 %vm330_vm0, %v313_v37 }
 0x18f   :  { %v2088_v38 = vpop.f32.mrb[0].mxu0  ;;  %v2116_v39 = vpop.f32.mrb[0].mxu1 }
 0x190   :  { %v445_v43 = vpop.f32.mrb[1].mxu0  ;;  %v851_v44 = vpop.f32.mrb[1].mxu1 }
 0x191   :  { %930 = vxpose.xlu1.b32.start [1/2] (short) (narrow) %v851_v44, 32  ;;  %524 = vxpose.xlu0.b32.start [1/2] (short) (narrow) %v445_v43, 32 }
 0x193   :  { %v2091_v48 = vpop.f32.mrb[2].mxu0  ;;  %v2119_v49 = vpop.f32.mrb[2].mxu1 }
 0x194   :  { %v455_v50 = vpop.f32.mrb[3].mxu0  ;;  %v861_v51 = vpop.f32.mrb[3].mxu1 }
 0x195   :  { %931 = vxpose.xlu1.b32.end [2/2] (short) (narrow) %v2116_v39, 32  ;;  %525 = vxpose.xlu0.b32.end [2/2] (short) (narrow) %v2088_v38, 32 }
 0x197   :  { %v2094_v52 = vpop.f32.mrb[4].mxu0  ;;  %v2122_v53 = vpop.f32.mrb[4].mxu1 }
 0x198   :  { %v465_v54 = vpop.f32.mrb[5].mxu0  ;;  %v871_v55 = vpop.f32.mrb[5].mxu1 }
 0x19b   :  { %v2097_v56 = vpop.f32.mrb[6].mxu0  ;;  %v2125_v57 = vpop.f32.mrb[6].mxu1 }
 0x19c   :  { %v475_v58 = vpop.f32.mrb[7].mxu0  ;;  %v881_v59 = vpop.f32.mrb[7].mxu1 }
 0x19e   :  { %962 = vxpose.xlu1.b32.start [1/2] (short) (narrow) %v861_v51, 32  ;;  %556 = vxpose.xlu0.b32.start [1/2] (short) (narrow) %v455_v50, 32 }
 0x19f   :  { %v2100_v60 = vpop.f32.mrb[8].mxu0  ;;  %v2128_v61 = vpop.f32.mrb[8].mxu1 }
 0x1a0   :  { %v485_v62 = vpop.f32.mrb[9].mxu0  ;;  %v891_v63 = vpop.f32.mrb[9].mxu1 }
 0x1a2   :  { %963 = vxpose.xlu1.b32.end [2/2] (short) (narrow) %v2119_v49, 32  ;;  %557 = vxpose.xlu0.b32.end [2/2] (short) (narrow) %v2091_v48, 32 }
 0x1a3   :  { %v2103_v0 = vpop.f32.mrb[10].mxu0  ;;  %v2131_v1 = vpop.f32.mrb[10].mxu1 }
 0x1a4   :  { %v495_v2 = vpop.f32.mrb[11].mxu0  ;;  %v901_v3 = vpop.f32.mrb[11].mxu1 }
 0x1a7   :  { %v2106_v4 = vpop.f32.mrb[12].mxu0  ;;  %v2134_v5 = vpop.f32.mrb[12].mxu1 }
 0x1a8   :  { %v505_v6 = vpop.f32.mrb[13].mxu0  ;;  %v911_v7 = vpop.f32.mrb[13].mxu1 }
 0x1ab   :  { %994 = vxpose.xlu1.b32.start [1/2] (short) (narrow) %v871_v55, 32  ;;  %588 = vxpose.xlu0.b32.start [1/2] (short) (narrow) %v465_v54, 32  ;;  %v2109_v8 = vpop.f32.mrb[14].mxu0  ;;  %v2137_v9 = vpop.f32.mrb[14].mxu1 }
 0x1ac   :  { %v515_v10 = vpop.f32.mrb[15].mxu0  ;;  %v921_v11 = vpop.f32.mrb[15].mxu1 }
 0x1af   :  { %995 = vxpose.xlu1.b32.end [2/2] (short) (narrow) %v2122_v53, 32  ;;  %589 = vxpose.xlu0.b32.end [2/2] (short) (narrow) %v2094_v52, 32 }
 0x1b8   :  { %1026 = vxpose.xlu1.b32.start [1/2] (short) (narrow) %v881_v59, 32  ;;  %620 = vxpose.xlu0.b32.start [1/2] (short) (narrow) %v475_v58, 32 }
 0x1bc   :  { %1027 = vxpose.xlu1.b32.end [2/2] (short) (narrow) %v2125_v57, 32  ;;  %621 = vxpose.xlu0.b32.end [2/2] (short) (narrow) %v2097_v56, 32 }
 0x1c5   :  { %1058 = vxpose.xlu1.b32.start [1/2] (short) (narrow) %v891_v63, 32  ;;  %652 = vxpose.xlu0.b32.start [1/2] (short) (narrow) %v485_v62, 32 }
 0x1c9   :  { %1059 = vxpose.xlu1.b32.end [2/2] (short) (narrow) %v2128_v61, 32  ;;  %653 = vxpose.xlu0.b32.end [2/2] (short) (narrow) %v2100_v60, 32 }
 0x1d2   :  { %1090 = vxpose.xlu1.b32.start [1/2] (short) (narrow) %v901_v3, 32  ;;  %684 = vxpose.xlu0.b32.start [1/2] (short) (narrow) %v495_v2, 32 }
 0x1d6   :  { %1091 = vxpose.xlu1.b32.end [2/2] (short) (narrow) %v2131_v1, 32  ;;  %685 = vxpose.xlu0.b32.end [2/2] (short) (narrow) %v2103_v0, 32 }
 0x1df   :  { %1122 = vxpose.xlu1.b32.start [1/2] (short) (narrow) %v911_v7, 32  ;;  %716 = vxpose.xlu0.b32.start [1/2] (short) (narrow) %v505_v6, 32 }
 0x1e3   :  { %1123 = vxpose.xlu1.b32.end [2/2] (short) (narrow) %v2134_v5, 32  ;;  %717 = vxpose.xlu0.b32.end [2/2] (short) (narrow) %v2106_v4, 32 }
 0x1ec   :  { %1154 = vxpose.xlu1.b32.start [1/2] (short) (narrow) %v921_v11, 32  ;;  %748 = vxpose.xlu0.b32.start [1/2] (short) (narrow) %v515_v10, 32 }
 0x1f0   :  { %1155 = vxpose.xlu1.b32.end [2/2] (short) (narrow) %v2137_v9, 32  ;;  %749 = vxpose.xlu0.b32.end [2/2] (short) (narrow) %v2109_v8, 32 }
 0x211   :  { %v946_v12 = vpop.trf.xlu1  ;;  %v540_v13 = vpop.trf.xlu0 }
 0x212   :  { %2142 = vmatprep.mubr.msk.f32.mxu1 %vm330_vm0, %v946_v12  ;;  %2194 = vmatprep.mubr.msk.f32.mxu0 %vm330_vm0, %v540_v13 }
 0x215   :  { %v947_v14 = vpop.trf.xlu1  ;;  %v541_v15 = vpop.trf.xlu0 }
 0x216   :  { %2143 = vmatmul.mubr.msk.f32.vlgmr.msra.gmra.mrb[16].mxu1 %vm330_vm0, %v947_v14  ;;  %2195 = vmatmul.mubr.msk.f32.vlgmr.msra.gmra.mrb[16].mxu0 %vm330_vm0, %v541_v15 }
 0x219   :  { %v948_v16 = vpop.trf.xlu1  ;;  %v542_v17 = vpop.trf.xlu0 }
 0x21a   :  { %2145 = vmatprep.mubr.msk.f32.mxu1 %vm330_vm0, %v948_v16  ;;  %2197 = vmatprep.mubr.msk.f32.mxu0 %vm330_vm0, %v542_v17 }
 0x21d   :  { %v949_v18 = vpop.trf.xlu1  ;;  %v543_v19 = vpop.trf.xlu0 }
 0x21e   :  { %2146 = vmatmul.mubr.msk.f32.gmra.mrb[18].mxu1 %vm330_vm0, %v949_v18  ;;  %2198 = vmatmul.mubr.msk.f32.gmra.mrb[18].mxu0 %vm330_vm0, %v543_v19 }
 0x221   :  { %v978_v20 = vpop.trf.xlu1  ;;  %v572_v21 = vpop.trf.xlu0 }
 0x222   :  { %2148 = vmatprep.mubr.msk.f32.mxu1 %vm330_vm0, %v978_v20  ;;  %2200 = vmatprep.mubr.msk.f32.mxu0 %vm330_vm0, %v572_v21 }
 0x225   :  { %v979_v22 = vpop.trf.xlu1  ;;  %v573_v23 = vpop.trf.xlu0 }
 0x226   :  { %2149 = vmatmul.mubr.msk.f32.gmra.mrb[20].mxu1 %vm330_vm0, %v979_v22  ;;  %2201 = vmatmul.mubr.msk.f32.gmra.mrb[20].mxu0 %vm330_vm0, %v573_v23 }
 0x229   :  { %v980_v24 = vpop.trf.xlu1  ;;  %v574_v25 = vpop.trf.xlu0 }
 0x22a   :  { %2151 = vmatprep.mubr.msk.f32.mxu1 %vm330_vm0, %v980_v24  ;;  %2203 = vmatprep.mubr.msk.f32.mxu0 %vm330_vm0, %v574_v25 }
 0x22d   :  { %v981_v26 = vpop.trf.xlu1  ;;  %v575_v27 = vpop.trf.xlu0 }
 0x22e   :  { %2152 = vmatmul.mubr.msk.f32.gmra.mrb[22].mxu1 %vm330_vm0, %v981_v26  ;;  %2204 = vmatmul.mubr.msk.f32.gmra.mrb[22].mxu0 %vm330_vm0, %v575_v27 }
 0x231   :  { %v1010_v28 = vpop.trf.xlu1  ;;  %v604_v29 = vpop.trf.xlu0 }
 0x232   :  { %2154 = vmatprep.mubr.msk.f32.mxu1 %vm330_vm0, %v1010_v28  ;;  %2206 = vmatprep.mubr.msk.f32.mxu0 %vm330_vm0, %v604_v29 }
 0x235   :  { %v1011_v30 = vpop.trf.xlu1  ;;  %v605_v31 = vpop.trf.xlu0 }
 0x236   :  { %2155 = vmatmul.mubr.msk.f32.gmra.mrb[24].mxu1 %vm330_vm0, %v1011_v30  ;;  %2207 = vmatmul.mubr.msk.f32.gmra.mrb[24].mxu0 %vm330_vm0, %v605_v31 }
 0x239   :  { %v1012_v32 = vpop.trf.xlu1  ;;  %v606_v33 = vpop.trf.xlu0 }
 0x23a   :  { %2157 = vmatprep.mubr.msk.f32.mxu1 %vm330_vm0, %v1012_v32  ;;  %2209 = vmatprep.mubr.msk.f32.mxu0 %vm330_vm0, %v606_v33 }
 0x23d   :  { %v1013_v34 = vpop.trf.xlu1  ;;  %v607_v35 = vpop.trf.xlu0 }
 0x23e   :  { %2158 = vmatmul.mubr.msk.f32.gmra.mrb[26].mxu1 %vm330_vm0, %v1013_v34  ;;  %2210 = vmatmul.mubr.msk.f32.gmra.mrb[26].mxu0 %vm330_vm0, %v607_v35 }
 0x241   :  { %v1042_v36 = vpop.trf.xlu1  ;;  %v636_v37 = vpop.trf.xlu0 }
 0x242   :  { %2160 = vmatprep.mubr.msk.f32.mxu1 %vm330_vm0, %v1042_v36  ;;  %2212 = vmatprep.mubr.msk.f32.mxu0 %vm330_vm0, %v636_v37 }
 0x245   :  { %v1043_v38 = vpop.trf.xlu1  ;;  %v637_v39 = vpop.trf.xlu0 }
 0x246   :  { %2161 = vmatmul.mubr.msk.f32.gmra.mrb[28].mxu1 %vm330_vm0, %v1043_v38  ;;  %2213 = vmatmul.mubr.msk.f32.gmra.mrb[28].mxu0 %vm330_vm0, %v637_v39 }
 0x249   :  { %v1044_v40 = vpop.trf.xlu1  ;;  %v638_v41 = vpop.trf.xlu0 }
 0x24a   :  { %2163 = vmatprep.mubr.msk.f32.mxu1 %vm330_vm0, %v1044_v40  ;;  %2215 = vmatprep.mubr.msk.f32.mxu0 %vm330_vm0, %v638_v41 }
 0x24d   :  { %v1045_v42 = vpop.trf.xlu1  ;;  %v639_v43 = vpop.trf.xlu0 }
 0x24e   :  { %2164 = vmatmul.mubr.msk.f32.gmra.mrb[30].mxu1 %vm330_vm0, %v1045_v42  ;;  %2216 = vmatmul.mubr.msk.f32.gmra.mrb[30].mxu0 %vm330_vm0, %v639_v43 }
 0x251   :  { %v1074_v44 = vpop.trf.xlu1  ;;  %v668_v45 = vpop.trf.xlu0 }
 0x252   :  { %2166 = vmatprep.mubr.msk.f32.mxu1 %vm330_vm0, %v1074_v44  ;;  %2218 = vmatprep.mubr.msk.f32.mxu0 %vm330_vm0, %v668_v45 }
 0x255   :  { %v1075_v46 = vpop.trf.xlu1  ;;  %v669_v47 = vpop.trf.xlu0 }
 0x256   :  { %2167 = vmatmul.mubr.msk.f32.gmra.mrb[32].mxu1 %vm330_vm0, %v1075_v46  ;;  %2219 = vmatmul.mubr.msk.f32.gmra.mrb[32].mxu0 %vm330_vm0, %v669_v47 }
 0x259   :  { %v1076_v48 = vpop.trf.xlu1  ;;  %v670_v49 = vpop.trf.xlu0 }
 0x25a   :  { %2169 = vmatprep.mubr.msk.f32.mxu1 %vm330_vm0, %v1076_v48  ;;  %2221 = vmatprep.mubr.msk.f32.mxu0 %vm330_vm0, %v670_v49 }
 0x25d   :  { %v1077_v50 = vpop.trf.xlu1  ;;  %v671_v51 = vpop.trf.xlu0 }
 0x25e   :  { %2170 = vmatmul.mubr.msk.f32.gmra.mrb[34].mxu1 %vm330_vm0, %v1077_v50  ;;  %2222 = vmatmul.mubr.msk.f32.gmra.mrb[34].mxu0 %vm330_vm0, %v671_v51 }
 0x261   :  { %v1106_v52 = vpop.trf.xlu1  ;;  %v700_v53 = vpop.trf.xlu0 }
 0x262   :  { %2172 = vmatprep.mubr.msk.f32.mxu1 %vm330_vm0, %v1106_v52  ;;  %2224 = vmatprep.mubr.msk.f32.mxu0 %vm330_vm0, %v700_v53 }
 0x265   :  { %v1107_v54 = vpop.trf.xlu1  ;;  %v701_v55 = vpop.trf.xlu0 }
 0x266   :  { %2173 = vmatmul.mubr.msk.f32.gmra.mrb[36].mxu1 %vm330_vm0, %v1107_v54  ;;  %2225 = vmatmul.mubr.msk.f32.gmra.mrb[36].mxu0 %vm330_vm0, %v701_v55 }
 0x269   :  { %v1108_v56 = vpop.trf.xlu1  ;;  %v702_v57 = vpop.trf.xlu0 }
 0x26a   :  { %2175 = vmatprep.mubr.msk.f32.mxu1 %vm330_vm0, %v1108_v56  ;;  %2227 = vmatprep.mubr.msk.f32.mxu0 %vm330_vm0, %v702_v57 }
 0x26d   :  { %v1109_v58 = vpop.trf.xlu1  ;;  %v703_v59 = vpop.trf.xlu0 }
 0x26e   :  { %2176 = vmatmul.mubr.msk.f32.gmra.mrb[38].mxu1 %vm330_vm0, %v1109_v58  ;;  %2228 = vmatmul.mubr.msk.f32.gmra.mrb[38].mxu0 %vm330_vm0, %v703_v59 }
 0x271   :  { %v1138_v60 = vpop.trf.xlu1  ;;  %v732_v61 = vpop.trf.xlu0 }
 0x272   :  { %2178 = vmatprep.mubr.msk.f32.mxu1 %vm330_vm0, %v1138_v60  ;;  %2230 = vmatprep.mubr.msk.f32.mxu0 %vm330_vm0, %v732_v61 }
 0x275   :  { %v1139_v62 = vpop.trf.xlu1  ;;  %v733_v63 = vpop.trf.xlu0 }
 0x276   :  { %2179 = vmatmul.mubr.msk.f32.gmra.mrb[40].mxu1 %vm330_vm0, %v1139_v62  ;;  %2231 = vmatmul.mubr.msk.f32.gmra.mrb[40].mxu0 %vm330_vm0, %v733_v63 }
 0x279   :  { %v1140_v0 = vpop.trf.xlu1  ;;  %v734_v1 = vpop.trf.xlu0 }
 0x27a   :  { %2181 = vmatprep.mubr.msk.f32.mxu1 %vm330_vm0, %v1140_v0  ;;  %2233 = vmatprep.mubr.msk.f32.mxu0 %vm330_vm0, %v734_v1 }
 0x27d   :  { %v1141_v2 = vpop.trf.xlu1  ;;  %v735_v3 = vpop.trf.xlu0 }
 0x27e   :  { %2182 = vmatmul.mubr.msk.f32.gmra.mrb[42].mxu1 %vm330_vm0, %v1141_v2  ;;  %2234 = vmatmul.mubr.msk.f32.gmra.mrb[42].mxu0 %vm330_vm0, %v735_v3 }
 0x281   :  { %v1170_v4 = vpop.trf.xlu1  ;;  %v764_v5 = vpop.trf.xlu0 }
 0x282   :  { %2184 = vmatprep.mubr.msk.f32.mxu1 %vm330_vm0, %v1170_v4  ;;  %2236 = vmatprep.mubr.msk.f32.mxu0 %vm330_vm0, %v764_v5 }
 0x285   :  { %v1171_v6 = vpop.trf.xlu1  ;;  %v765_v7 = vpop.trf.xlu0 }
 0x286   :  { %2185 = vmatmul.mubr.msk.f32.gmra.mrb[44].mxu1 %vm330_vm0, %v1171_v6  ;;  %2237 = vmatmul.mubr.msk.f32.gmra.mrb[44].mxu0 %vm330_vm0, %v765_v7 }
 0x289   :  { %v1172_v8 = vpop.trf.xlu1  ;;  %v766_v9 = vpop.trf.xlu0 }
 0x28a   :  { %2187 = vmatprep.mubr.msk.f32.mxu1 %vm330_vm0, %v1172_v8  ;;  %2239 = vmatprep.mubr.msk.f32.mxu0 %vm330_vm0, %v766_v9 }
 0x28d   :  { %v1173_v10 = vpop.trf.xlu1  ;;  %v767_v11 = vpop.trf.xlu0 }
 0x28e   :  { %2188 = vmatmul.mubr.msk.f32.gmra.mrb[46].mxu1 %vm330_vm0, %v1173_v10  ;;  %2240 = vmatmul.mubr.msk.f32.gmra.mrb[46].mxu0 %vm330_vm0, %v767_v11 }
 0x2e9   :  { %v2144_v12 = vpop.f32.mrb[16].mxu1  ;;  %v2196_v13 = vpop.f32.mrb[16].mxu0 }
 0x2ea   :  { %v1678_v14 = vadd.f32 %v2196_v13, %v2144_v12  ;;  %v1351_v15 = vpop.f32.mrb[17].mxu1  ;;  %v1672_v16 = vpop.f32.mrb[17].mxu0 }
 0x2eb   :  { %v1673_v17 = vadd.f32 %v1672_v16, %v1351_v15 }
 0x2ec   :  { %1833 = vst.msk [vmem:[#allocation8 + $0x8] sm:$0xff] %vm1831_vm1, %v1678_v14 }
 0x2ed   :  { %1832 = vst.msk [vmem:[#allocation8] sm:$0xff] %vm1831_vm1, %v1673_v17 }
 0x2f1   :  { %v2147_v18 = vpop.f32.mrb[18].mxu1  ;;  %v2199_v19 = vpop.f32.mrb[18].mxu0 }
 0x2f2   :  { %v1688_v20 = vadd.f32 %v2199_v19, %v2147_v18  ;;  %v1361_v21 = vpop.f32.mrb[19].mxu1  ;;  %v1682_v22 = vpop.f32.mrb[19].mxu0 }
 0x2f3   :  { %v1683_v23 = vadd.f32 %v1682_v22, %v1361_v21 }
 0x2f4   :  { %1835 = vst.msk [vmem:[#allocation8 + $0x18] sm:$0xff] %vm1831_vm1, %v1688_v20 }
 0x2f5   :  { %1834 = vst.msk [vmem:[#allocation8 + $0x10] sm:$0xff] %vm1831_vm1, %v1683_v23 }
 0x2f9   :  { %v2150_v24 = vpop.f32.mrb[20].mxu1  ;;  %v2202_v25 = vpop.f32.mrb[20].mxu0 }
 0x2fa   :  { %v1698_v26 = vadd.f32 %v2202_v25, %v2150_v24  ;;  %v1371_v27 = vpop.f32.mrb[21].mxu1  ;;  %v1692_v28 = vpop.f32.mrb[21].mxu0 }
 0x2fb   :  { %v1693_v29 = vadd.f32 %v1692_v28, %v1371_v27 }
 0x2fc   :  { %1837 = vst.msk [vmem:[#allocation8 + $0x28] sm:$0xff] %vm1831_vm1, %v1698_v26 }
 0x2fd   :  { %1836 = vst.msk [vmem:[#allocation8 + $0x20] sm:$0xff] %vm1831_vm1, %v1693_v29 }
 0x301   :  { %v2153_v30 = vpop.f32.mrb[22].mxu1  ;;  %v2205_v31 = vpop.f32.mrb[22].mxu0 }
 0x302   :  { %v1708_v32 = vadd.f32 %v2205_v31, %v2153_v30  ;;  %v1381_v33 = vpop.f32.mrb[23].mxu1  ;;  %v1702_v34 = vpop.f32.mrb[23].mxu0 }
 0x303   :  { %v1703_v35 = vadd.f32 %v1702_v34, %v1381_v33 }
 0x304   :  { %1839 = vst.msk [vmem:[#allocation8 + $0x38] sm:$0xff] %vm1831_vm1, %v1708_v32 }
 0x305   :  { %1838 = vst.msk [vmem:[#allocation8 + $0x30] sm:$0xff] %vm1831_vm1, %v1703_v35 }
 0x309   :  { %v2156_v36 = vpop.f32.mrb[24].mxu1  ;;  %v2208_v37 = vpop.f32.mrb[24].mxu0 }
 0x30a   :  { %v1718_v38 = vadd.f32 %v2208_v37, %v2156_v36  ;;  %v1391_v39 = vpop.f32.mrb[25].mxu1  ;;  %v1712_v40 = vpop.f32.mrb[25].mxu0 }
 0x30b   :  { %v1713_v41 = vadd.f32 %v1712_v40, %v1391_v39 }
 0x30c   :  { %1841 = vst.msk [vmem:[#allocation8 + $0x48] sm:$0xff] %vm1831_vm1, %v1718_v38 }
 0x30d   :  { %1840 = vst.msk [vmem:[#allocation8 + $0x40] sm:$0xff] %vm1831_vm1, %v1713_v41 }
 0x311   :  { %v2159_v42 = vpop.f32.mrb[26].mxu1  ;;  %v2211_v43 = vpop.f32.mrb[26].mxu0 }
 0x312   :  { %v1728_v44 = vadd.f32 %v2211_v43, %v2159_v42  ;;  %v1401_v45 = vpop.f32.mrb[27].mxu1  ;;  %v1722_v46 = vpop.f32.mrb[27].mxu0 }
 0x313   :  { %v1723_v47 = vadd.f32 %v1722_v46, %v1401_v45 }
 0x314   :  { %1843 = vst.msk [vmem:[#allocation8 + $0x58] sm:$0xff] %vm1831_vm1, %v1728_v44 }
 0x315   :  { %1842 = vst.msk [vmem:[#allocation8 + $0x50] sm:$0xff] %vm1831_vm1, %v1723_v47 }
 0x319   :  { %v2162_v48 = vpop.f32.mrb[28].mxu1  ;;  %v2214_v49 = vpop.f32.mrb[28].mxu0 }
 0x31a   :  { %v1738_v50 = vadd.f32 %v2214_v49, %v2162_v48  ;;  %v1411_v51 = vpop.f32.mrb[29].mxu1  ;;  %v1732_v52 = vpop.f32.mrb[29].mxu0 }
 0x31b   :  { %v1733_v53 = vadd.f32 %v1732_v52, %v1411_v51 }
 0x31c   :  { %1845 = vst.msk [vmem:[#allocation8 + $0x68] sm:$0xff] %vm1831_vm1, %v1738_v50 }
 0x31d   :  { %1844 = vst.msk [vmem:[#allocation8 + $0x60] sm:$0xff] %vm1831_vm1, %v1733_v53 }
 0x321   :  { %v2165_v54 = vpop.f32.mrb[30].mxu1  ;;  %v2217_v55 = vpop.f32.mrb[30].mxu0 }
 0x322   :  { %v1748_v56 = vadd.f32 %v2217_v55, %v2165_v54  ;;  %v1421_v57 = vpop.f32.mrb[31].mxu1  ;;  %v1742_v58 = vpop.f32.mrb[31].mxu0 }
 0x323   :  { %v1743_v59 = vadd.f32 %v1742_v58, %v1421_v57 }
 0x324   :  { %1847 = vst.msk [vmem:[#allocation8 + $0x78] sm:$0xff] %vm1831_vm1, %v1748_v56 }
 0x325   :  { %1846 = vst.msk [vmem:[#allocation8 + $0x70] sm:$0xff] %vm1831_vm1, %v1743_v59 }
 0x329   :  { %v2168_v60 = vpop.f32.mrb[32].mxu1  ;;  %v2220_v61 = vpop.f32.mrb[32].mxu0 }
 0x32a   :  { %v1758_v62 = vadd.f32 %v2220_v61, %v2168_v60  ;;  %v1431_v63 = vpop.f32.mrb[33].mxu1  ;;  %v1752_v0 = vpop.f32.mrb[33].mxu0 }
 0x32b   :  { %v1753_v1 = vadd.f32 %v1752_v0, %v1431_v63 }
 0x32c   :  { %1849 = vst.msk [vmem:[#allocation8 + $0x88] sm:$0xff] %vm1831_vm1, %v1758_v62 }
 0x32d   :  { %1848 = vst.msk [vmem:[#allocation8 + $0x80] sm:$0xff] %vm1831_vm1, %v1753_v1 }
 0x331   :  { %v2171_v2 = vpop.f32.mrb[34].mxu1  ;;  %v2223_v3 = vpop.f32.mrb[34].mxu0 }
 0x332   :  { %v1768_v4 = vadd.f32 %v2223_v3, %v2171_v2  ;;  %v1441_v5 = vpop.f32.mrb[35].mxu1  ;;  %v1762_v6 = vpop.f32.mrb[35].mxu0 }
 0x333   :  { %v1763_v7 = vadd.f32 %v1762_v6, %v1441_v5 }
 0x334   :  { %1851 = vst.msk [vmem:[#allocation8 + $0x98] sm:$0xff] %vm1831_vm1, %v1768_v4 }
 0x335   :  { %1850 = vst.msk [vmem:[#allocation8 + $0x90] sm:$0xff] %vm1831_vm1, %v1763_v7 }
 0x339   :  { %v2174_v8 = vpop.f32.mrb[36].mxu1  ;;  %v2226_v9 = vpop.f32.mrb[36].mxu0 }
 0x33a   :  { %v1778_v10 = vadd.f32 %v2226_v9, %v2174_v8  ;;  %v1451_v11 = vpop.f32.mrb[37].mxu1  ;;  %v1772_v12 = vpop.f32.mrb[37].mxu0 }
 0x33b   :  { %v1773_v13 = vadd.f32 %v1772_v12, %v1451_v11 }
 0x33c   :  { %1853 = vst.msk [vmem:[#allocation8 + $0xa8] sm:$0xff] %vm1831_vm1, %v1778_v10 }
 0x33d   :  { %1852 = vst.msk [vmem:[#allocation8 + $0xa0] sm:$0xff] %vm1831_vm1, %v1773_v13 }
 0x341   :  { %v2177_v14 = vpop.f32.mrb[38].mxu1  ;;  %v2229_v15 = vpop.f32.mrb[38].mxu0 }
 0x342   :  { %v1788_v16 = vadd.f32 %v2229_v15, %v2177_v14  ;;  %v1461_v17 = vpop.f32.mrb[39].mxu1  ;;  %v1782_v18 = vpop.f32.mrb[39].mxu0 }
 0x343   :  { %v1783_v19 = vadd.f32 %v1782_v18, %v1461_v17 }
 0x344   :  { %1855 = vst.msk [vmem:[#allocation8 + $0xb8] sm:$0xff] %vm1831_vm1, %v1788_v16 }
 0x345   :  { %1854 = vst.msk [vmem:[#allocation8 + $0xb0] sm:$0xff] %vm1831_vm1, %v1783_v19 }
 0x349   :  { %v2180_v20 = vpop.f32.mrb[40].mxu1  ;;  %v2232_v21 = vpop.f32.mrb[40].mxu0 }
 0x34a   :  { %v1798_v22 = vadd.f32 %v2232_v21, %v2180_v20  ;;  %v1471_v23 = vpop.f32.mrb[41].mxu1  ;;  %v1792_v24 = vpop.f32.mrb[41].mxu0 }
 0x34b   :  { %v1793_v25 = vadd.f32 %v1792_v24, %v1471_v23 }
 0x34c   :  { %1857 = vst.msk [vmem:[#allocation8 + $0xc8] sm:$0xff] %vm1831_vm1, %v1798_v22 }
 0x34d   :  { %1856 = vst.msk [vmem:[#allocation8 + $0xc0] sm:$0xff] %vm1831_vm1, %v1793_v25 }
 0x351   :  { %v2183_v26 = vpop.f32.mrb[42].mxu1  ;;  %v2235_v27 = vpop.f32.mrb[42].mxu0 }
 0x352   :  { %v1808_v28 = vadd.f32 %v2235_v27, %v2183_v26  ;;  %v1481_v29 = vpop.f32.mrb[43].mxu1  ;;  %v1802_v30 = vpop.f32.mrb[43].mxu0 }
 0x353   :  { %v1803_v31 = vadd.f32 %v1802_v30, %v1481_v29 }
 0x354   :  { %1859 = vst.msk [vmem:[#allocation8 + $0xd8] sm:$0xff] %vm1831_vm1, %v1808_v28 }
 0x355   :  { %1858 = vst.msk [vmem:[#allocation8 + $0xd0] sm:$0xff] %vm1831_vm1, %v1803_v31 }
 0x359   :  { %v2186_v32 = vpop.f32.mrb[44].mxu1  ;;  %v2238_v33 = vpop.f32.mrb[44].mxu0 }
 0x35a   :  { %v1818_v34 = vadd.f32 %v2238_v33, %v2186_v32  ;;  %v1491_v35 = vpop.f32.mrb[45].mxu1  ;;  %v1812_v36 = vpop.f32.mrb[45].mxu0 }
 0x35b   :  { %v1813_v37 = vadd.f32 %v1812_v36, %v1491_v35 }
 0x35c   :  { %1861 = vst.msk [vmem:[#allocation8 + $0xe8] sm:$0xff] %vm1831_vm1, %v1818_v34 }
 0x35d   :  { %1860 = vst.msk [vmem:[#allocation8 + $0xe0] sm:$0xff] %vm1831_vm1, %v1813_v37 }
 0x361   :  { %v2189_v38 = vpop.f32.mrb[46].mxu1  ;;  %v2241_v39 = vpop.f32.mrb[46].mxu0 }
 0x362   :  { %v1828_v40 = vadd.f32 %v2241_v39, %v2189_v38  ;;  %v1501_v41 = vpop.f32.mrb[47].mxu1  ;;  %v1822_v42 = vpop.f32.mrb[47].mxu0 }
 0x363   :  { %v1823_v43 = vadd.f32 %v1822_v42, %v1501_v41 }
 0x364   :  { %1863 = vst.msk [vmem:[#allocation8 + $0xf8] sm:$0xff] %vm1831_vm1, %v1828_v40 }
 0x365   :  { %1862 = vst.msk [vmem:[#allocation8 + $0xf0] sm:$0xff] %vm1831_vm1, %v1823_v43 }
 0x366   :  { %2374 = shalt.err (!%p2371_p0)
}
 0x367   :  { %s2375_s27 = scalar_lea.hbm %s2615_s3, 4096 }
 0x368   :  { %p2376_p1 = scmp.ne.s32.totalorder %s2615_s3, %s2375_s27  ;;  %p2379_p2 = scmp.lt.u32.totalorder %s2375_s27, %s2615_s3 }
 0x36a   :  { %p2381_p3 = pnand %p2379_p2, %p2376_p1 }
 0x36c   :  { %2384 = shalt.err (!%p2381_p3)
}
 0x36d   :  { %1875 = dma.vmem_to_hbm [thread:$0]  %s1870_s21, 4096, %s2615_s3, [#allocation4], %s2393_s24, %s2393_s24, %s2394_s25  }
 0x36e   :  { %2389 = dma.done.wait [#allocation4], 4096  }
 0x36f   :  { %2390 = vsyncadd [#allocation4], 4294963200 }
 0x370   :  { %1879 = vsyncpa [#allocation3], 1 }
 0x371   :  { %1880 = vsyncpa [#allocation6], 1 }
 0x372   :  { %1881 = vsyncpa [#allocation4], 1 }

</bundles_post_ra>
